<compile_context>
chip_gen: v7x
topology: tpu7x:2x2x1
jax: 0.10.0
libtpu: 0.0.40
codegen_flags: <defaults>
</compile_context>

<pallas_src>
import jax
import jax.numpy as jnp
from jax.experimental import pallas as pl
from jax.experimental.pallas import tpu as pltpu

SIGMA_MIN = 0.1  # GP-noise scale on the conditional path


def ffm_loss_kernel(x0_ref, x1_ref, gp_ref, mask_ref, t_ref,
                    w1t_ref, wt_ref, b1_ref, w2t_ref, b2_ref, out_ref):
    """One grid step == one lane tile of flattened points (B*N on lanes).

    Lane-major operands:
      x0, x1, gp           : (D, T)   point features, points on lanes
      mask, t              : (1, T)   per-point node mask / per-point time
      w1t (H,D), wt (H,1), b1 (H,1), w2t (D,H), b2 (D,1) : intrinsic-model weights
      out                  : (1, T)   per-point partial loss  sum_D 0.5*diff^2
    """
    t = t_ref[...]           # (1, T)
    mask = mask_ref[...]     # (1, T)
    x0 = x0_ref[...]         # (D, T)
    x1 = x1_ref[...]         # (D, T)
    gp = gp_ref[...]         # (D, T)

    # Conditional probability path sample + target velocity (all VPU work).
    x_t = (1.0 - t) * x0 + t * x1 + SIGMA_MIN * gp
    velocity = x1 - x0

    # Intrinsic velocity model (transposed): h^T = W1^T @ x_t^T  -> (H, T)
    h = jnp.dot(w1t_ref[...], x_t, preferred_element_type=jnp.float32)
    h = h + b1_ref[...] + wt_ref[...] * t
    h = jax.nn.gelu(h, approximate=True)
    v_hat = jnp.dot(w2t_ref[...], h,
                    preferred_element_type=jnp.float32) + b2_ref[...]

    # Node mask applied pre-square (exact semantics, handles fractional masks).
    diff = (v_hat - velocity) * mask                       # (D, T)
    # Reduce over D (sublane axis) -> lane-dense (1, T) unmasked store.
    out_ref[...] = jnp.sum(0.5 * diff * diff, axis=0, keepdims=True)


def functional_flow_matching_loss(t, x0, x1, gp, node_mask, params):
    """Scalar loss = mean_{B,D}( sum_N 0.5*((v_hat - v)*mask)^2 )."""
    B, N, D = x0.shape
    W1, wt, b1, W2, b2 = params
    H = W1.shape[1]

    BN = B * N
    # Lane tile: 128 at toy sizes, up to 512 for large point counts
    # (bigger tiles amortize the per-grid-step overhead).
    lane_tile = min(512, pl.cdiv(BN, 128) * 128)
    num_tiles = pl.cdiv(BN, lane_tile)
    BN_pad = num_tiles * lane_tile
    pad = BN_pad - BN

    # ---- layout plumbing: put the big (B*N) axis on lanes ------------------
    def to_lane_major(a):                        # (B, N, D) -> (D, BN_pad)
        a2 = a.reshape(BN, D).T
        if pad:
            a2 = jnp.pad(a2, ((0, 0), (0, pad)))
        return a2

    x0_l = to_lane_major(x0)
    x1_l = to_lane_major(x1)
    gp_l = to_lane_major(gp)

    mask_l = node_mask.reshape(1, BN)
    t_l = jnp.repeat(t, N).reshape(1, BN)        # per-point time row
    if pad:                                      # padded lanes masked -> 0 loss
        mask_l = jnp.pad(mask_l, ((0, 0), (0, pad)))
        t_l = jnp.pad(t_l, ((0, 0), (0, pad)))

    # Transposed weights so both matmuls produce lane-dense (., T) tiles.
    W1T = W1.T                                   # (H, D)
    W2T = W2.T                                   # (D, H)
    b1c = b1.reshape(H, 1)
    wtc = wt.reshape(H, 1)
    b2c = b2.reshape(D, 1)

    partial = pl.pallas_call(
        ffm_loss_kernel,
        out_shape=jax.ShapeDtypeStruct((1, BN_pad), jnp.float32),
        grid_spec=pltpu.PrefetchScalarGridSpec(
            num_scalar_prefetch=0,
            grid=(num_tiles,),
            in_specs=[
                pl.BlockSpec((D, lane_tile), lambda i: (0, i)),   # x0 (D, BN)
                pl.BlockSpec((D, lane_tile), lambda i: (0, i)),   # x1
                pl.BlockSpec((D, lane_tile), lambda i: (0, i)),   # gp
                pl.BlockSpec((1, lane_tile), lambda i: (0, i)),   # node_mask row
                pl.BlockSpec((1, lane_tile), lambda i: (0, i)),   # per-point t row
                pl.BlockSpec((H, D), lambda i: (0, 0)),           # W1^T (resident)
                pl.BlockSpec((H, 1), lambda i: (0, 0)),           # wt
                pl.BlockSpec((H, 1), lambda i: (0, 0)),           # b1
                pl.BlockSpec((D, H), lambda i: (0, 0)),           # W2^T
                pl.BlockSpec((D, 1), lambda i: (0, 0)),           # b2
            ],
            out_specs=pl.BlockSpec((1, lane_tile), lambda i: (0, i)),
        ),
        compiler_params=pltpu.CompilerParams(
            dimension_semantics=("parallel",)),
    )(x0_l, x1_l, gp_l, mask_l, t_l, W1T, wtc, b1c, W2T, b2c)

    # torch: mean( sum(0.5*diff^2, dim=1) ) over (B, D) == sum(partials)/(B*D)
    return jnp.sum(partial) / (B * D)


def reference_loss(t, x0, x1, gp, node_mask, params):
    """Pure-JAX reference for correctness checking."""
    W1, wt, b1, W2, b2 = params
    tb = t[:, None, None]
    x_t = (1.0 - tb) * x0 + tb * x1 + SIGMA_MIN * gp
    velocity = x1 - x0
    h = jnp.einsum("bnd,dh->bnh", x_t, W1) + b1[None] + tb * wt[None]
    h = jax.nn.gelu(h, approximate=True)
    v_hat = jnp.einsum("bnh,hd->bnd", h, W2) + b2[None]
    diff = (v_hat - velocity) * node_mask
    return jnp.mean(jnp.sum(0.5 * diff * diff, axis=1))


if __name__ == "__main__":
    B, N, D, H = 2, 64, 8, 32

    key = jax.random.PRNGKey(0)
    k = jax.random.split(key, 10)

    # data
    x0 = jax.random.normal(k[0], (B, N, D), dtype=jnp.float32)
    x1 = jax.random.normal(k[1], (B, N, D), dtype=jnp.float32)
    gp = jax.random.normal(k[2], (B, N, D), dtype=jnp.float32)   # GP samples
    node_mask = (jax.random.uniform(k[3], (B, N, 1)) > 0.2).astype(jnp.float32)
    t = jax.random.uniform(k[4], (B,), dtype=jnp.float32)        # t ~ U(0, t_max=1)

    # deterministic synthetic intrinsic-model parameters
    W1 = 0.1 * jax.random.normal(k[5], (D, H), dtype=jnp.float32)
    wt = 0.1 * jax.random.normal(k[6], (1, H), dtype=jnp.float32)
    b1 = jnp.zeros((1, H), dtype=jnp.float32)
    W2 = 0.1 * jax.random.normal(k[7], (H, D), dtype=jnp.float32)
    b2 = jnp.zeros((1, D), dtype=jnp.float32)
    params = (W1, wt, b1, W2, b2)

    loss_fn = jax.jit(functional_flow_matching_loss)
    loss = jax.block_until_ready(loss_fn(t, x0, x1, gp, node_mask, params))

    ref = reference_loss(t, x0, x1, gp, node_mask, params)
    assert jnp.allclose(loss, ref, rtol=1e-3, atol=1e-3), (loss, ref)

    print("KERNEL_OK")
</pallas_src>

<mosaic_0001>
module attributes {stable_mosaic.version = 11 : i64} {
  func.func @ffm_loss_kernel(%arg0: i32, %arg1: memref<8x128xf32, #tpu.memory_space<vmem>>, %arg2: memref<8x128xf32, #tpu.memory_space<vmem>>, %arg3: memref<8x128xf32, #tpu.memory_space<vmem>>, %arg4: memref<1x128xf32, #tpu.memory_space<vmem>>, %arg5: memref<1x128xf32, #tpu.memory_space<vmem>>, %arg6: memref<32x8xf32, #tpu.memory_space<vmem>>, %arg7: memref<32x1xf32, #tpu.memory_space<vmem>>, %arg8: memref<32x1xf32, #tpu.memory_space<vmem>>, %arg9: memref<8x32xf32, #tpu.memory_space<vmem>>, %arg10: memref<8x1xf32, #tpu.memory_space<vmem>>, %arg11: memref<1x128xf32, #tpu.memory_space<vmem>>) attributes {dimension_semantics = [#tpu.dimension_semantics<parallel>], iteration_bounds = array<i64: 1>, scalar_prefetch = 0 : i64, scratch_operands = 0 : i64, tpu.core_type = #tpu.core_type<tc>, window_params = [{transform_indices = @transform_0, window_bounds = array<i64: 8, 128>}, {transform_indices = @transform_1, window_bounds = array<i64: 8, 128>}, {transform_indices = @transform_2, window_bounds = array<i64: 8, 128>}, {transform_indices = @transform_3, window_bounds = array<i64: 1, 128>}, {transform_indices = @transform_4, window_bounds = array<i64: 1, 128>}, {pipeline_mode = #tpu.pipeline_mode<synchronous>, transform_indices = @transform_5, window_bounds = array<i64: 32, 8>}, {pipeline_mode = #tpu.pipeline_mode<synchronous>, transform_indices = @transform_6, window_bounds = array<i64: 32, 1>}, {pipeline_mode = #tpu.pipeline_mode<synchronous>, transform_indices = @transform_7, window_bounds = array<i64: 32, 1>}, {pipeline_mode = #tpu.pipeline_mode<synchronous>, transform_indices = @transform_8, window_bounds = array<i64: 8, 32>}, {pipeline_mode = #tpu.pipeline_mode<synchronous>, transform_indices = @transform_9, window_bounds = array<i64: 8, 1>}, {transform_indices = @transform_10, window_bounds = array<i64: 1, 128>}]} {
    %c0 = arith.constant 0 : index
    %c0_0 = arith.constant 0 : index
    %0 = vector.load %arg5[%c0, %c0_0] : memref<1x128xf32, #tpu.memory_space<vmem>>, vector<1x128xf32>
    %c0_1 = arith.constant 0 : index
    %c0_2 = arith.constant 0 : index
    %1 = vector.load %arg4[%c0_1, %c0_2] : memref<1x128xf32, #tpu.memory_space<vmem>>, vector<1x128xf32>
    %c0_3 = arith.constant 0 : index
    %c0_4 = arith.constant 0 : index
    %2 = vector.load %arg1[%c0_3, %c0_4] : memref<8x128xf32, #tpu.memory_space<vmem>>, vector<8x128xf32>
    %c0_5 = arith.constant 0 : index
    %c0_6 = arith.constant 0 : index
    %3 = vector.load %arg2[%c0_5, %c0_6] : memref<8x128xf32, #tpu.memory_space<vmem>>, vector<8x128xf32>
    %c0_7 = arith.constant 0 : index
    %c0_8 = arith.constant 0 : index
    %4 = vector.load %arg3[%c0_7, %c0_8] : memref<8x128xf32, #tpu.memory_space<vmem>>, vector<8x128xf32>
    %cst = arith.constant 1.000000e+00 : f32
    %5 = vector.broadcast %cst : f32 to vector<1x128xf32>
    %6 = arith.subf %5, %0 : vector<1x128xf32>
    %7 = vector.broadcast %6 : vector<1x128xf32> to vector<8x128xf32>
    %8 = arith.mulf %7, %2 : vector<8x128xf32>
    %9 = vector.broadcast %0 : vector<1x128xf32> to vector<8x128xf32>
    %10 = arith.mulf %9, %3 : vector<8x128xf32>
    %11 = arith.addf %8, %10 : vector<8x128xf32>
    %cst_9 = arith.constant 1.000000e-01 : f32
    %12 = vector.broadcast %cst_9 : f32 to vector<8x128xf32>
    %13 = arith.mulf %12, %4 : vector<8x128xf32>
    %14 = arith.addf %11, %13 : vector<8x128xf32>
    %15 = arith.subf %3, %2 : vector<8x128xf32>
    %c0_10 = arith.constant 0 : index
    %c0_11 = arith.constant 0 : index
    %16 = vector.load %arg6[%c0_10, %c0_11] : memref<32x8xf32, #tpu.memory_space<vmem>>, vector<32x8xf32>
    %cst_12 = arith.constant dense<0.000000e+00> : vector<32x128xf32>
    %17 = tpu.matmul %16, %14, %cst_12 {dimension_numbers = #tpu.dot_dimension_numbers<[1], [0], [0], [1], [0, 0, 1, 1], [], []>} : vector<32x8xf32>, vector<8x128xf32>, vector<32x128xf32> -> vector<32x128xf32>
    %c0_13 = arith.constant 0 : index
    %c0_14 = arith.constant 0 : index
    %18 = vector.load %arg8[%c0_13, %c0_14] : memref<32x1xf32, #tpu.memory_space<vmem>>, vector<32x1xf32>
    %19 = vector.broadcast %18 : vector<32x1xf32> to vector<32x128xf32>
    %20 = arith.addf %17, %19 : vector<32x128xf32>
    %c0_15 = arith.constant 0 : index
    %c0_16 = arith.constant 0 : index
    %21 = vector.load %arg7[%c0_15, %c0_16] : memref<32x1xf32, #tpu.memory_space<vmem>>, vector<32x1xf32>
    %22 = vector.broadcast %21 : vector<32x1xf32> to vector<32x128xf32>
    %23 = vector.broadcast %0 : vector<1x128xf32> to vector<32x128xf32>
    %24 = arith.mulf %22, %23 : vector<32x128xf32>
    %25 = arith.addf %20, %24 : vector<32x128xf32>
    %26 = arith.mulf %25, %25 : vector<32x128xf32>
    %27 = arith.mulf %25, %26 : vector<32x128xf32>
    %cst_17 = arith.constant 4.471500e-02 : f32
    %28 = vector.broadcast %cst_17 : f32 to vector<32x128xf32>
    %29 = arith.mulf %28, %27 : vector<32x128xf32>
    %30 = arith.addf %25, %29 : vector<32x128xf32>
    %cst_18 = arith.constant 0.797884583 : f32
    %31 = vector.broadcast %cst_18 : f32 to vector<32x128xf32>
    %32 = arith.mulf %31, %30 : vector<32x128xf32>
    %33 = math.tanh %32 : vector<32x128xf32>
    %cst_19 = arith.constant 1.000000e+00 : f32
    %34 = vector.broadcast %cst_19 : f32 to vector<32x128xf32>
    %35 = arith.addf %34, %33 : vector<32x128xf32>
    %cst_20 = arith.constant 5.000000e-01 : f32
    %36 = vector.broadcast %cst_20 : f32 to vector<32x128xf32>
    %37 = arith.mulf %36, %35 : vector<32x128xf32>
    %38 = arith.mulf %25, %37 : vector<32x128xf32>
    %c0_21 = arith.constant 0 : index
    %c0_22 = arith.constant 0 : index
    %39 = vector.load %arg9[%c0_21, %c0_22] : memref<8x32xf32, #tpu.memory_space<vmem>>, vector<8x32xf32>
    %cst_23 = arith.constant dense<0.000000e+00> : vector<8x128xf32>
    %40 = tpu.matmul %39, %38, %cst_23 {dimension_numbers = #tpu.dot_dimension_numbers<[1], [0], [0], [1], [0, 0, 1, 1], [], []>} : vector<8x32xf32>, vector<32x128xf32>, vector<8x128xf32> -> vector<8x128xf32>
    %c0_24 = arith.constant 0 : index
    %c0_25 = arith.constant 0 : index
    %41 = vector.load %arg10[%c0_24, %c0_25] : memref<8x1xf32, #tpu.memory_space<vmem>>, vector<8x1xf32>
    %42 = vector.broadcast %41 : vector<8x1xf32> to vector<8x128xf32>
    %43 = arith.addf %40, %42 : vector<8x128xf32>
    %44 = arith.subf %43, %15 : vector<8x128xf32>
    %45 = vector.broadcast %1 : vector<1x128xf32> to vector<8x128xf32>
    %46 = arith.mulf %44, %45 : vector<8x128xf32>
    %cst_26 = arith.constant 5.000000e-01 : f32
    %47 = vector.broadcast %cst_26 : f32 to vector<8x128xf32>
    %48 = arith.mulf %47, %46 : vector<8x128xf32>
    %49 = arith.mulf %48, %46 : vector<8x128xf32>
    %cst_27 = arith.constant dense<0.000000e+00> : vector<128xf32>
    %50 = vector.multi_reduction <add>, %49, %cst_27 [0] : vector<8x128xf32> to vector<128xf32>
    %51 = vector.shape_cast %50 : vector<128xf32> to vector<1x128xf32>
    %c0_28 = arith.constant 0 : index
    %c0_29 = arith.constant 0 : index
    %52 = vector.load %arg11[%c0_28, %c0_29] : memref<1x128xf32, #tpu.memory_space<vmem>>, vector<1x128xf32>
    tpu.vector_store %arg11[%c0_28, %c0_29], %51 {strides = array<i32>} : memref<1x128xf32, #tpu.memory_space<vmem>>, vector<1x128xf32>,
    return
  }
  func.func @transform_0(%arg0: i32) -> (i32, i32) {
    %c0_i32 = arith.constant 0 : i32
    %c0_i32_0 = arith.constant 0 : i32
    return %c0_i32, %arg0 : i32, i32
  }
  func.func @transform_1(%arg0: i32) -> (i32, i32) {
    %c0_i32 = arith.constant 0 : i32
    %c0_i32_0 = arith.constant 0 : i32
    return %c0_i32, %arg0 : i32, i32
  }
  func.func @transform_2(%arg0: i32) -> (i32, i32) {
    %c0_i32 = arith.constant 0 : i32
    %c0_i32_0 = arith.constant 0 : i32
    return %c0_i32, %arg0 : i32, i32
  }
  func.func @transform_3(%arg0: i32) -> (i32, i32) {
    %c0_i32 = arith.constant 0 : i32
    %c0_i32_0 = arith.constant 0 : i32
    return %c0_i32, %arg0 : i32, i32
  }
  func.func @transform_4(%arg0: i32) -> (i32, i32) {
    %c0_i32 = arith.constant 0 : i32
    %c0_i32_0 = arith.constant 0 : i32
    return %c0_i32, %arg0 : i32, i32
  }
  func.func @transform_5(%arg0: i32) -> (i32, i32) {
    %c0_i32 = arith.constant 0 : i32
    %c0_i32_0 = arith.constant 0 : i32
    %c0_i32_1 = arith.constant 0 : i32
    return %c0_i32, %c0_i32_0 : i32, i32
  }
  func.func @transform_6(%arg0: i32) -> (i32, i32) {
    %c0_i32 = arith.constant 0 : i32
    %c0_i32_0 = arith.constant 0 : i32
    %c0_i32_1 = arith.constant 0 : i32
    return %c0_i32, %c0_i32_0 : i32, i32
  }
  func.func @transform_7(%arg0: i32) -> (i32, i32) {
    %c0_i32 = arith.constant 0 : i32
    %c0_i32_0 = arith.constant 0 : i32
    %c0_i32_1 = arith.constant 0 : i32
    return %c0_i32, %c0_i32_0 : i32, i32
  }
  func.func @transform_8(%arg0: i32) -> (i32, i32) {
    %c0_i32 = arith.constant 0 : i32
    %c0_i32_0 = arith.constant 0 : i32
    %c0_i32_1 = arith.constant 0 : i32
    return %c0_i32, %c0_i32_0 : i32, i32
  }
  func.func @transform_9(%arg0: i32) -> (i32, i32) {
    %c0_i32 = arith.constant 0 : i32
    %c0_i32_0 = arith.constant 0 : i32
    %c0_i32_1 = arith.constant 0 : i32
    return %c0_i32, %c0_i32_0 : i32, i32
  }
  func.func @transform_10(%arg0: i32) -> (i32, i32) {
    %c0_i32 = arith.constant 0 : i32
    %c0_i32_0 = arith.constant 0 : i32
    return %c0_i32, %arg0 : i32, i32
  }
}

</mosaic_0001>

<bundles_post_ra>
// kernel: functional_flow_matching_loss.1
= control target key start
LH: loop header
LB: loop body
LE: loop exit
PB: predicated region body
PF: predicated region fallthrough
CT: control target
= control target key end

     0   :  { %v42_v0 = vlaneseq  ;;  %vm87_vm0 = vcmask 64512   ;;  %v410_v2 = vmov 0   ;;  %v411_v29 = vmov 0.0|0.0   ;;  %s543_s4 = inlined_call_operand.vmem [shape: f32[1,128], index: 4, kind: input, shape index: {}]   ;;  %s544_s5 = inlined_call_operand.vmem [shape: f32[32,8], index: 5, kind: input, shape index: {}]   ;;  %s545_s7 = inlined_call_operand.vmem [shape: f32[32,1], index: 7, kind: input, shape index: {}]   ;;  %s546_s0 = inlined_call_operand.vmem [shape: f32[8,128], index: 0, kind: input, shape index: {}]   ;;  %s547_s6 = inlined_call_operand.vmem [shape: f32[32,1], index: 6, kind: input, shape index: {}]   ;;  %s548_s1 = inlined_call_operand.vmem [shape: f32[8,128], index: 1, kind: input, shape index: {}]   ;;  %s549_s2 = inlined_call_operand.vmem [shape: f32[8,128], index: 2, kind: input, shape index: {}]   ;;  %s550_s9 = inlined_call_operand.vmem [shape: f32[8,1], index: 9, kind: input, shape index: {}]   ;;  %s551_s8 = inlined_call_operand.vmem [shape: f32[8,32], index: 8, kind: input, shape index: {}]   ;;  %s552_s3 = inlined_call_operand.vmem [shape: f32[1,128], index: 3, kind: input, shape index: {}]   ;;  %s553_s10 = inlined_call_operand.vmem [shape: f32[1,128], index: 10, kind: output, shape index: {}]  }
   0x1   :  { %v35_v1 = vld [vmem:[%s543_s4] sm:$0x1]  ;;  %400 = vset.pattern.permute.xlu0 %v410_v2  ;;  %401 = vset.pattern.permute.xlu1 %v410_v2  ;;  %v64_v12 = vld [vmem:[%s545_s7 + $0x8] sm:$0xff]  ;;  %v65_v19 = vld [vmem:[%s545_s7 + $0x10] sm:$0xff]  ;;  %vm412_vm1 = vmmov 0   ;;  %v413_v30 = vmov 0.0  }
   0x2   :  { %v40_v3 = vsub.f32 1.0, %v35_v1  ;;  %v43_v4 = vshrl.u32 %v42_v0, 7  ;;  %v59_v5 = vld [vmem:[%s544_s5] sm:$0xff]  ;;  %v186_v15 = vld [vmem:[%s547_s6 + $0x8] sm:$0xff]  ;;  %v66_v21 = vld [vmem:[%s545_s7 + $0x18] sm:$0xff]  ;;  %390 = vmatprep.subr.bf16.mxu1 %v411_v29  ;;  %387 = vmatprep.mubr.msk.f32.mxu1 %vm412_vm1, %v413_v30  ;;  %vm260_vm2 = vcmask 261120  }
   0x3   :  { %373 = vmatprep.mubr.msk.f32.mxu0 %vm87_vm0, %v59_v5  ;;  %v63_v6 = vld [vmem:[%s545_s7] sm:$0xff]  ;;  %v60_v23 = vld [vmem:[%s544_s5 + $0x8] sm:$0xff]  ;;  %v187_v24 = vld [vmem:[%s547_s6 + $0x10] sm:$0xff] }
   0x4   :  { %v482_v7 = vld [vmem:[%s546_s0] sm:$0xff]  ;;  %v44_v8 = vsub.s32 0, %v43_v4  ;;  %69 = vperm.xlu0 %400, %v63_v6   ;;  %v61_v25 = vld [vmem:[%s544_s5 + $0x10] sm:$0xff]  ;;  %v188_v26 = vld [vmem:[%s547_s6 + $0x18] sm:$0xff] }
   0x5   :  { %v185_v9 = vld [vmem:[%s547_s6] sm:$0xff]  ;;  %v62_v27 = vld [vmem:[%s544_s5 + $0x18] sm:$0xff] }
   0x6   :  { %v490_v10 = vld [vmem:[%s548_s1] sm:$0xff]  ;;  %191 = vperm.xlu1 %401, %v185_v9   ;;  %v45_v13 = vrot.slane %v40_v3, %v44_v8  ;;  %v52_v14 = vrot.slane %v35_v1, %v44_v8 }
   0x7   :  { %v39_v11 = vld [vmem:[%s549_s2] sm:$0xff] }
   0x8   :  { %v47_v16 = vmul.f32 %v45_v13, %v482_v7  ;;  %v54_v17 = vmul.f32 %v52_v14, %v490_v10  ;;  %v56_v18 = vmul.f32 0.1, %v39_v11  ;;  %74 = vperm.xlu0 %400, %v64_v12   ;;  %v254_v28 = vld [vmem:[%s550_s9] sm:$0xff] }
   0xa   :  { %196 = vperm.xlu1 %401, %v186_v15   ;;  %v55_v20 = vadd.f32 %v54_v17, %v47_v16 }
   0xc   :  { %v57_v22 = vadd.f32 %v56_v18, %v55_v20  ;;  %79 = vperm.xlu0 %400, %v65_v19  }
   0xe   :  { %84 = vperm.xlu1 %401, %v66_v21   ;;  %371 = vmatprep.subr.mxu0 %v57_v22 }
   0xf   :  { %372 = vmatpush3.msra.mxu0 %v57_v22 }
  0x10   :  { %374 = vmatmul.mubr.msk.f32.vlgmr.msra.gmra.mrb[0].mxu0 %vm87_vm0, %v60_v23  ;;  %201 = vperm.xlu0 %400, %v187_v24  }
  0x11   :  { %376 = vmatprep.mubr.msk.f32.mxu0 %vm87_vm0, %v61_v25 }
  0x12   :  { %206 = vperm.xlu1 %401, %v188_v26  }
  0x14   :  { %377 = vmatmul.mubr.msk.f32.gmra.mrb[2].mxu0 %vm87_vm0, %v62_v27  ;;  %257 = vperm.xlu0 %400, %v254_v28  }
  0x83   :  { %v70_v32 = vpop.permute.xlu0 %69 }
  0x85   :  { %v192_v31 = vpop.permute.xlu1 %191 }
  0x86   :  { %v209_v41 = vmul.f32 %v192_v31, %v52_v14 }
  0x87   :  { %v75_v34 = vpop.permute.xlu0 %74 }
  0x89   :  { %v197_v33 = vpop.permute.xlu1 %196 }
  0x8a   :  { %v210_v38 = vmul.f32 %v197_v33, %v52_v14  ;;  %v58_v33 = vsub.f32 %v490_v10, %v482_v7 }
  0x8b   :  { %v80_v36 = vpop.permute.xlu0 %79 }
  0x8d   :  { %v85_v35 = vpop.permute.xlu1 %84 }
  0x8f   :  { %v202_v47 = vpop.permute.xlu0 %201 }
  0x90   :  { %v211_v52 = vmul.f32 %v202_v47, %v52_v14 }
  0x91   :  { %v207_v42 = vpop.permute.xlu1 %206 }
  0x92   :  { %v212_v48 = vmul.f32 %v207_v42, %v52_v14 }
  0xe3   :  { %v375_v37 = vpop.f32.mrb[0].mxu0 }
  0xe4   :  { %v172_v39 = vadd.f32 %v375_v37, %v75_v34  ;;  %v166_v40 = vpop.f32.mrb[1].mxu0  ;;  %v258_v34 = vpop.permute.xlu0 %257 }
  0xe5   :  { %v167_v43 = vadd.f32 %v166_v40, %v70_v32  ;;  %v253_v32 = vld [vmem:[%s551_s8] sm:$0xff] }
  0xe6   :  { %v214_v44 = vadd.f32 %v210_v38, %v172_v39  ;;  %v360_v38 = vld [vmem:[%s552_s3] ss:$0 sm:$0xff] }
  0xe7   :  { %v213_v45 = vadd.f32 %v209_v41, %v167_v43  ;;  %v378_v46 = vpop.f32.mrb[2].mxu0 }
  0xe8   :  { %v218_v49 = vmul.f32 %v214_v44, %v214_v44  ;;  %v182_v50 = vadd.f32 %v378_v46, %v85_v35  ;;  %v176_v51 = vpop.f32.mrb[3].mxu0 }
  0xe9   :  { %v217_v53 = vmul.f32 %v213_v45, %v213_v45  ;;  %v177_v54 = vadd.f32 %v176_v51, %v80_v36 }
  0xea   :  { %v222_v55 = vmul.f32 %v218_v49, %v214_v44  ;;  %v216_v56 = vadd.f32 %v212_v48, %v182_v50 }
  0xeb   :  { %v221_v57 = vmul.f32 %v217_v53, %v213_v45  ;;  %v215_v58 = vadd.f32 %v211_v52, %v177_v54 }
  0xec   :  { %v226_v59 = vmul.f32 0.044715, %v222_v55  ;;  %v220_v60 = vmul.f32 %v216_v56, %v216_v56 }
  0xed   :  { %v225_v61 = vmul.f32 0.044715, %v221_v57  ;;  %v219_v62 = vmul.f32 %v215_v58, %v215_v58 }
  0xee   :  { %v224_v63 = vmul.f32 %v220_v60, %v216_v56  ;;  %v230_v0 = vadd.f32 %v226_v59, %v214_v44 }
  0xef   :  { %v223_v1 = vmul.f32 %v219_v62, %v215_v58  ;;  %v229_v2 = vadd.f32 %v225_v61, %v213_v45 }
  0xf0   :  { %v228_v3 = vmul.f32 0.044715, %v224_v63  ;;  %v234_v4 = vmul.f32 0.7978846, %v230_v0 }
  0xf1   :  { %v227_v5 = vmul.f32 0.044715, %v223_v1  ;;  %v233_v6 = vmul.f32 0.7978846, %v229_v2 }
  0xf2   :  { %v232_v8 = vadd.f32 %v228_v3, %v216_v56  ;;  %402 = vtanh.f32 %v234_v4 }
  0xf3   :  { %v231_v9 = vadd.f32 %v227_v5, %v215_v58  ;;  %404 = vtanh.f32 %v233_v6 }
  0xf4   :  { %v236_v11 = vmul.f32 0.7978846, %v232_v8 }
  0xf5   :  { %v235_v12 = vmul.f32 0.7978846, %v231_v9 }
  0xf6   :  { %406 = vtanh.f32 %v236_v11 }
  0xf7   :  { %408 = vtanh.f32 %v235_v12 }
  0xfc   :  { %v403_v13 = vpop.eup %402 }
  0xfd   :  { %v405_v14 = vpop.eup %404  ;;  %v242_v15 = vadd.f32 1.0, %v403_v13 }
  0xfe   :  { %v241_v16 = vadd.f32 1.0, %v405_v14 }
  0xff   :  { %v246_v17 = vmul.f32 0.5, %v242_v15 }
 0x100   :  { %v407_v18 = vpop.eup %406  ;;  %v245_v19 = vmul.f32 0.5, %v241_v16 }
 0x101   :  { %v409_v20 = vpop.eup %408  ;;  %v250_v21 = vmul.f32 %v246_v17, %v214_v44  ;;  %v244_v22 = vadd.f32 1.0, %v407_v18 }
 0x102   :  { %v249_v23 = vmul.f32 %v245_v19, %v213_v45  ;;  %v243_v24 = vadd.f32 1.0, %v409_v20 }
 0x103   :  { %v248_v25 = vmul.f32 0.5, %v244_v22 }
 0x104   :  { %v391_v26 = vpack.c.bf16 %v250_v21, %v249_v23  ;;  %v247_v27 = vmul.f32 0.5, %v243_v24 }
 0x105   :  { %v252_v28 = vmul.f32 %v248_v25, %v216_v56 }
 0x106   :  { %392 = vmatpush3.bf16.msra.mxu1 %v391_v26  ;;  %v251_v30 = vmul.f32 %v247_v27, %v215_v58 }
 0x107   :  { %393 = vmatprep.subr.bf16.mxu1 %v411_v29 }
 0x108   :  { %v394_v31 = vpack.c.bf16 %v252_v28, %v251_v30 }
 0x10a   :  { %395 = vmatpush3.bf16.msra.mxu1 %v394_v31 }
 0x10d   :  { %388 = vmatmul.mubr.msk.f32.vlgmr.msra.gmra.mrb[0].mxu1 %vm260_vm2, %v253_v32 }
 0x1e0   :  { %v330_v35 = vpop.f32.mrb[0].mxu1 }
 0x1e1   :  { %v331_v36 = vadd.f32 %v330_v35, %v258_v34  ;;  %v389_v37 = vpop.f32.mrb[1].mxu1 }
 0x1e3   :  { %v334_v29 = vsub.f32 %v331_v36, %v58_v33 }
 0x1e5   :  { %v341_v39 = vmul.f32 %v360_v38, %v334_v29 }
 0x1e7   :  { %v342_v40 = vmul.f32 0.5, %v341_v39 }
 0x1e9   :  { %v343_v41 = vmul.f32 %v342_v40, %v341_v39 }
 0x1eb   :  { %v344_v42 = vrot.slane %v343_v41, 4 }
 0x1ed   :  { %v345_v43 = vadd.f32 %v344_v42, %v343_v41 }
 0x1ef   :  { %v346_v44 = vrot.slane %v345_v43, 2 }
 0x1f1   :  { %v347_v45 = vadd.f32 %v346_v44, %v345_v43 }
 0x1f3   :  { %v348_v46 = vrot.slane %v347_v45, 1 }
 0x1f5   :  { %v349_v47 = vadd.f32 %v348_v46, %v347_v45 }
 0x1f7   :  { %350 = vst [vmem:[%s553_s10] sm:$0x1] %v349_v47 }

</bundles_post_ra>
